<compile_context>
chip_gen: v7x
topology: tpu7x:2x2x1
jax: 0.10.0
libtpu: 0.0.40
codegen_flags: <defaults>
</compile_context>

<pallas_src>
import jax
import jax.numpy as jnp
from jax.experimental import pallas as pl
from jax.experimental.pallas import tpu as pltpu


# ----------------------------- kernel bodies ------------------------------- #

def _sgu_compute(u, v, w1_ref, b1_ref, w2_ref, b2_ref, o_ref):
    # v = proj(v): MXU matmul with f32 accumulation, bias add on the VPU.
    v_proj = jnp.dot(v, w1_ref[...], preferred_element_type=jnp.float32)
    v_proj = v_proj + b1_ref[...].astype(jnp.float32)
    # Gate in f32 (safe on v5e, no bf16 VPU); downcast only for the second MXU op.
    g = u.astype(jnp.float32) * v_proj
    out = jnp.dot(g.astype(w2_ref.dtype), w2_ref[...],
                  preferred_element_type=jnp.float32)
    out = out + b2_ref[...].astype(jnp.float32)
    o_ref[...] = out.astype(o_ref.dtype)


def _sgu_kernel_split(u_ref, v_ref, w1_ref, b1_ref, w2_ref, b2_ref, o_ref):
    # u/v arrive as separate lane-dense (TM, Hh) tiles (DMA-level chunk).
    _sgu_compute(u_ref[...], v_ref[...], w1_ref, b1_ref, w2_ref, b2_ref, o_ref)


def _sgu_kernel_fused(x_ref, w1_ref, b1_ref, w2_ref, b2_ref, o_ref):
    hh = x_ref.shape[-1] // 2
    # Lazy ref slices at point of use (no full-tile value materialized first).
    v = x_ref[:, hh:]
    u = x_ref[:, :hh]
    _sgu_compute(u, v, w1_ref, b1_ref, w2_ref, b2_ref, o_ref)


# ------------------------------ host wrapper ------------------------------- #

def _round_up(x, m):
    return (x + m - 1) // m * m


def _vmem_capacity_bytes():
    try:
        return int(pltpu.get_tpu_info().vmem_capacity_bytes)
    except Exception:
        return 64 << 20          # conservative fallback: v7x per-TC VMEM


def spatial_gating_unit(x, w1, b1, w2, b2, *, tm=None, weight_dtype=None):
    """x: (B, S, H); w1: (H/2, H/2) [out,in]; b1: (H/2,);
    w2: (H, H/2) [out,in]; b2: (H,).  Returns (B, S, H)."""
    B, S, H = x.shape
    assert H % 2 == 0
    Hh = H // 2
    M = B * S
    x2 = x.reshape(M, H)

    # Weights pre-transposed to (in, out); bf16 weights when activations are
    # bf16 (single-pass MXU) — accumulation stays f32. Biases kept in f32.
    if weight_dtype is None:
        weight_dtype = jnp.bfloat16 if x.dtype == jnp.bfloat16 else w1.dtype
    w1_t = w1.T.astype(weight_dtype)                 # (Hh, Hh)
    w2_t = w2.T.astype(weight_dtype)                 # (Hh, H)
    b1_2 = b1.reshape(1, Hh).astype(jnp.float32)
    b2_2 = b2.reshape(1, H).astype(jnp.float32)

    itm = jnp.dtype(x.dtype).itemsize
    w_itm = jnp.dtype(weight_dtype).itemsize
    sublane_pack = {4: 8, 2: 16, 1: 32}.get(itm, 8)  # dtype sublane packing

    # --- generation-aware VMEM budget --------------------------------------
    vmem_cap = _vmem_capacity_bytes()
    budget = int(vmem_cap * 0.8)                     # leave compiler headroom
    weight_bytes = 2 * ((Hh * Hh + Hh * H) * w_itm + (Hh + H) * 4)
    per_row = 4 * H * itm + 3 * H * 4                # 2x-buffered x/out + f32 temps

    # --- token-tile size ----------------------------------------------------
    if tm is None:
        big_vmem = vmem_cap >= (96 << 20)            # v5e / v6e: 128 MiB VMEM
        target = (1024 if itm <= 2 else 512) if big_vmem else (512 if itm <= 2 else 256)
        fit = max(sublane_pack, (budget - weight_bytes - (4 << 20)) // per_row)
        tm = min(target, fit, _round_up(M, sublane_pack))
        if tm >= 256:
            tm -= tm % 256                           # full MXU row granularity
        if tm >= M and M > 2 * sublane_pack:
            tm = _round_up(pl.cdiv(M, 2), sublane_pack)  # >=2 tiles for v7x megacore
        tm = max(sublane_pack, _round_up(tm, sublane_pack))
    else:
        tm = max(sublane_pack, _round_up(int(tm), sublane_pack))

    vmem_est = tm * per_row + weight_bytes + (4 << 20)
    vmem_limit = int(min(max(budget, 32 << 20), max(32 << 20, vmem_est)))

    # Ragged last tile handled by Pallas OOB masking -> no jnp.pad HBM copy.
    grid = (pl.cdiv(M, tm),)

    # Advisory cost so XLA overlaps neighbors with this custom call correctly.
    flops = 2 * M * Hh * (Hh + H) + M * Hh
    bytes_accessed = (2 * M * H * itm                       # x read + out write
                      + (Hh * Hh + Hh * H) * w_itm + (Hh + H) * 4)
    cost = pl.CostEstimate(flops=flops, transcendentals=0,
                           bytes_accessed=bytes_accessed)

    compiler_params = pltpu.CompilerParams(
        dimension_semantics=("parallel",),           # megacore sharding on v7x
        vmem_limit_bytes=vmem_limit)

    lane_aligned = (Hh % 128 == 0)

    def _build(single_buffer_weights):
        def _resident(shape):
            index_map = lambda i, _n=len(shape): (0,) * _n
            if single_buffer_weights:
                try:
                    return pl.BlockSpec(shape, index_map,
                                        pipeline_mode=pl.Buffered(1))
                except (TypeError, AttributeError):
                    pass
            return pl.BlockSpec(shape, index_map)

        w_specs = [_resident((Hh, Hh)), _resident((1, Hh)),
                   _resident((Hh, H)), _resident((1, H))]

        if lane_aligned:
            # DMA-level u/v chunk: two lane-dense (tm, Hh) views of the same x.
            kernel = _sgu_kernel_split
            in_specs = [pl.BlockSpec((tm, Hh), lambda i: (i, 0)),   # u half
                        pl.BlockSpec((tm, Hh), lambda i: (i, 1)),   # v half
                        *w_specs]
        else:
            # Unaligned Hh (small demo shapes): one tile, lazy in-kernel slices.
            kernel = _sgu_kernel_fused
            in_specs = [pl.BlockSpec((tm, H), lambda i: (i, 0)), *w_specs]

        return pl.pallas_call(
            kernel,
            out_shape=jax.ShapeDtypeStruct((M, H), x.dtype),
            grid=grid,
            in_specs=in_specs,
            out_specs=pl.BlockSpec((tm, H), lambda i: (i, 0)),
            compiler_params=compiler_params,
            cost_estimate=cost,
        )

    args = ((x2, x2, w1_t, b1_2, w2_t, b2_2) if lane_aligned
            else (x2, w1_t, b1_2, w2_t, b2_2))

    try:
        out = _build(single_buffer_weights=True)(*args)
    except Exception:
        # pl.Buffered(1) on resident weights unsupported on this jax/Mosaic:
        # fall back to default double-buffered resident weights (same math).
        out = _build(single_buffer_weights=False)(*args)

    return out.reshape(B, S, H)


# ---------------------------------- demo ----------------------------------- #

if __name__ == "__main__":
    # small shapes: batch=2, seq=8, hidden=32 -> hidden//2 = 16
    B, S, H = 2, 8, 32
    Hh = H // 2

    key = jax.random.PRNGKey(0)
    kx, kw1, kb1, kw2, kb2 = jax.random.split(key, 5)

    x = jax.random.normal(kx, (B, S, H), dtype=jnp.float32)

    # "nn.Linear"-style parameters (PyTorch weight layout: (out, in))
    w1 = jax.random.normal(kw1, (Hh, Hh), dtype=jnp.float32) * 0.1
    b1 = jax.random.normal(kb1, (Hh,), dtype=jnp.float32) * 0.1
    w2 = jax.random.normal(kw2, (H, Hh), dtype=jnp.float32) * 0.1
    b2 = jax.random.normal(kb2, (H,), dtype=jnp.float32) * 0.1

    # tm=8 so the tiny demo exercises a multi-tile grid (grid=(2,)).
    out = spatial_gating_unit(x, w1, b1, w2, b2, tm=8)
    out = jax.block_until_ready(out)

    # pure-JAX reference of the same math (f32 path; bf16 would need looser tol)
    u_ref, v_ref = x[..., :Hh], x[..., Hh:]
    ref = (u_ref * (v_ref @ w1.T + b1)) @ w2.T + b2
    assert out.shape == (B, S, H)
    assert jnp.allclose(out, ref, atol=1e-4, rtol=1e-4), \
        float(jnp.max(jnp.abs(out - ref)))

    print("KERNEL_OK")
</pallas_src>

<mosaic_0001>
module attributes {stable_mosaic.version = 11 : i64} {
  func.func @_sgu_kernel_fused(%arg0: i32, %arg1: memref<8x32xf32, #tpu.memory_space<vmem>>, %arg2: memref<16x16xf32, #tpu.memory_space<vmem>>, %arg3: memref<1x16xf32, #tpu.memory_space<vmem>>, %arg4: memref<16x32xf32, #tpu.memory_space<vmem>>, %arg5: memref<1x32xf32, #tpu.memory_space<vmem>>, %arg6: memref<8x32xf32, #tpu.memory_space<vmem>>) attributes {dimension_semantics = [#tpu.dimension_semantics<parallel>], iteration_bounds = array<i64: 2>, scalar_prefetch = 0 : i64, scratch_operands = 0 : i64, tpu.core_type = #tpu.core_type<tc>, window_params = [{transform_indices = @transform_0, window_bounds = array<i64: 8, 32>}, {pipeline_mode = #tpu.pipeline_mode<synchronous>, transform_indices = @transform_1, window_bounds = array<i64: 16, 16>}, {pipeline_mode = #tpu.pipeline_mode<synchronous>, transform_indices = @transform_2, window_bounds = array<i64: 1, 16>}, {pipeline_mode = #tpu.pipeline_mode<synchronous>, transform_indices = @transform_3, window_bounds = array<i64: 16, 32>}, {pipeline_mode = #tpu.pipeline_mode<synchronous>, transform_indices = @transform_4, window_bounds = array<i64: 1, 32>}, {transform_indices = @transform_5, window_bounds = array<i64: 8, 32>}]} {
    %c0 = arith.constant 0 : index
    %c16 = arith.constant 16 : index
    %0 = vector.load %arg1[%c0, %c16] : memref<8x32xf32, #tpu.memory_space<vmem>>, vector<8x16xf32>
    %c0_0 = arith.constant 0 : index
    %c0_1 = arith.constant 0 : index
    %1 = vector.load %arg1[%c0_0, %c0_1] : memref<8x32xf32, #tpu.memory_space<vmem>>, vector<8x16xf32>
    %c0_2 = arith.constant 0 : index
    %c0_3 = arith.constant 0 : index
    %2 = vector.load %arg2[%c0_2, %c0_3] : memref<16x16xf32, #tpu.memory_space<vmem>>, vector<16x16xf32>
    %cst = arith.constant dense<0.000000e+00> : vector<8x16xf32>
    %3 = tpu.matmul %0, %2, %cst {dimension_numbers = #tpu.dot_dimension_numbers<[1], [0], [0], [1], [0, 0, 1, 1], [], []>} : vector<8x16xf32>, vector<16x16xf32>, vector<8x16xf32> -> vector<8x16xf32>
    %c0_4 = arith.constant 0 : index
    %c0_5 = arith.constant 0 : index
    %4 = vector.load %arg3[%c0_4, %c0_5] : memref<1x16xf32, #tpu.memory_space<vmem>>, vector<1x16xf32>
    %5 = vector.broadcast %4 : vector<1x16xf32> to vector<8x16xf32>
    %6 = arith.addf %3, %5 : vector<8x16xf32>
    %7 = arith.mulf %1, %6 : vector<8x16xf32>
    %c0_6 = arith.constant 0 : index
    %c0_7 = arith.constant 0 : index
    %8 = vector.load %arg4[%c0_6, %c0_7] : memref<16x32xf32, #tpu.memory_space<vmem>>, vector<16x32xf32>
    %cst_8 = arith.constant dense<0.000000e+00> : vector<8x32xf32>
    %9 = tpu.matmul %7, %8, %cst_8 {dimension_numbers = #tpu.dot_dimension_numbers<[1], [0], [0], [1], [0, 0, 1, 1], [], []>} : vector<8x16xf32>, vector<16x32xf32>, vector<8x32xf32> -> vector<8x32xf32>
    %c0_9 = arith.constant 0 : index
    %c0_10 = arith.constant 0 : index
    %10 = vector.load %arg5[%c0_9, %c0_10] : memref<1x32xf32, #tpu.memory_space<vmem>>, vector<1x32xf32>
    %11 = vector.broadcast %10 : vector<1x32xf32> to vector<8x32xf32>
    %12 = arith.addf %9, %11 : vector<8x32xf32>
    %c0_11 = arith.constant 0 : index
    %c0_12 = arith.constant 0 : index
    %13 = vector.load %arg6[%c0_11, %c0_12] : memref<8x32xf32, #tpu.memory_space<vmem>>, vector<8x32xf32>
    tpu.vector_store %arg6[%c0_11, %c0_12], %12 {strides = array<i32>} : memref<8x32xf32, #tpu.memory_space<vmem>>, vector<8x32xf32>,
    return
  }
  func.func @transform_0(%arg0: i32) -> (i32, i32) {
    %c0_i32 = arith.constant 0 : i32
    %c0_i32_0 = arith.constant 0 : i32
    return %arg0, %c0_i32 : i32, i32
  }
  func.func @transform_1(%arg0: i32) -> (i32, i32) {
    %c0_i32 = arith.constant 0 : i32
    %c0_i32_0 = arith.constant 0 : i32
    %c0_i32_1 = arith.constant 0 : i32
    return %c0_i32, %c0_i32_0 : i32, i32
  }
  func.func @transform_2(%arg0: i32) -> (i32, i32) {
    %c0_i32 = arith.constant 0 : i32
    %c0_i32_0 = arith.constant 0 : i32
    %c0_i32_1 = arith.constant 0 : i32
    return %c0_i32, %c0_i32_0 : i32, i32
  }
  func.func @transform_3(%arg0: i32) -> (i32, i32) {
    %c0_i32 = arith.constant 0 : i32
    %c0_i32_0 = arith.constant 0 : i32
    %c0_i32_1 = arith.constant 0 : i32
    return %c0_i32, %c0_i32_0 : i32, i32
  }
  func.func @transform_4(%arg0: i32) -> (i32, i32) {
    %c0_i32 = arith.constant 0 : i32
    %c0_i32_0 = arith.constant 0 : i32
    %c0_i32_1 = arith.constant 0 : i32
    return %c0_i32, %c0_i32_0 : i32, i32
  }
  func.func @transform_5(%arg0: i32) -> (i32, i32) {
    %c0_i32 = arith.constant 0 : i32
    %c0_i32_0 = arith.constant 0 : i32
    return %arg0, %c0_i32 : i32, i32
  }
}

module attributes {stable_mosaic.version = 11 : i64} {
  func.func @_sgu_kernel_fused(%arg0: i32, %arg1: memref<8x32xf32, #tpu.memory_space<vmem>>, %arg2: memref<16x16xf32, #tpu.memory_space<vmem>>, %arg3: memref<1x16xf32, #tpu.memory_space<vmem>>, %arg4: memref<16x32xf32, #tpu.memory_space<vmem>>, %arg5: memref<1x32xf32, #tpu.memory_space<vmem>>, %arg6: memref<8x32xf32, #tpu.memory_space<vmem>>) attributes {dimension_semantics = [#tpu.dimension_semantics<parallel>], iteration_bounds = array<i64: 2>, scalar_prefetch = 0 : i64, scratch_operands = 0 : i64, tpu.core_type = #tpu.core_type<tc>, window_params = [{transform_indices = @transform_0, window_bounds = array<i64: 8, 32>}, {pipeline_mode = #tpu.pipeline_mode<synchronous>, transform_indices = @transform_1, window_bounds = array<i64: 16, 16>}, {pipeline_mode = #tpu.pipeline_mode<synchronous>, transform_indices = @transform_2, window_bounds = array<i64: 1, 16>}, {pipeline_mode = #tpu.pipeline_mode<synchronous>, transform_indices = @transform_3, window_bounds = array<i64: 16, 32>}, {pipeline_mode = #tpu.pipeline_mode<synchronous>, transform_indices = @transform_4, window_bounds = array<i64: 1, 32>}, {transform_indices = @transform_5, window_bounds = array<i64: 8, 32>}]} {
    %c0 = arith.constant 0 : index
    %c16 = arith.constant 16 : index
    %0 = vector.load %arg1[%c0, %c16] : memref<8x32xf32, #tpu.memory_space<vmem>>, vector<8x16xf32>
    %c0_0 = arith.constant 0 : index
    %c0_1 = arith.constant 0 : index
    %1 = vector.load %arg1[%c0_0, %c0_1] : memref<8x32xf32, #tpu.memory_space<vmem>>, vector<8x16xf32>
    %c0_2 = arith.constant 0 : index
    %c0_3 = arith.constant 0 : index
    %2 = vector.load %arg2[%c0_2, %c0_3] : memref<16x16xf32, #tpu.memory_space<vmem>>, vector<16x16xf32>
    %cst = arith.constant dense<0.000000e+00> : vector<8x16xf32>
    %3 = tpu.matmul %0, %2, %cst {dimension_numbers = #tpu.dot_dimension_numbers<[1], [0], [0], [1], [0, 0, 1, 1], [], []>} : vector<8x16xf32>, vector<16x16xf32>, vector<8x16xf32> -> vector<8x16xf32>
    %c0_4 = arith.constant 0 : index
    %c0_5 = arith.constant 0 : index
    %4 = vector.load %arg3[%c0_4, %c0_5] : memref<1x16xf32, #tpu.memory_space<vmem>>, vector<1x16xf32>
    %5 = vector.broadcast %4 : vector<1x16xf32> to vector<8x16xf32>
    %6 = arith.addf %3, %5 : vector<8x16xf32>
    %7 = arith.mulf %1, %6 : vector<8x16xf32>
    %c0_6 = arith.constant 0 : index
    %c0_7 = arith.constant 0 : index
    %8 = vector.load %arg4[%c0_6, %c0_7] : memref<16x32xf32, #tpu.memory_space<vmem>>, vector<16x32xf32>
    %cst_8 = arith.constant dense<0.000000e+00> : vector<8x32xf32>
    %9 = tpu.matmul %7, %8, %cst_8 {dimension_numbers = #tpu.dot_dimension_numbers<[1], [0], [0], [1], [0, 0, 1, 1], [], []>} : vector<8x16xf32>, vector<16x32xf32>, vector<8x32xf32> -> vector<8x32xf32>
    %c0_9 = arith.constant 0 : index
    %c0_10 = arith.constant 0 : index
    %10 = vector.load %arg5[%c0_9, %c0_10] : memref<1x32xf32, #tpu.memory_space<vmem>>, vector<1x32xf32>
    %11 = vector.broadcast %10 : vector<1x32xf32> to vector<8x32xf32>
    %12 = arith.addf %9, %11 : vector<8x32xf32>
    %c0_11 = arith.constant 0 : index
    %c0_12 = arith.constant 0 : index
    %13 = vector.load %arg6[%c0_11, %c0_12] : memref<8x32xf32, #tpu.memory_space<vmem>>, vector<8x32xf32>
    tpu.vector_store %arg6[%c0_11, %c0_12], %12 {strides = array<i32>} : memref<8x32xf32, #tpu.memory_space<vmem>>, vector<8x32xf32>,
    return
  }
  func.func @transform_0(%arg0: i32) -> (i32, i32) {
    %c0_i32 = arith.constant 0 : i32
    %c0_i32_0 = arith.constant 0 : i32
    return %arg0, %c0_i32 : i32, i32
  }
  func.func @transform_1(%arg0: i32) -> (i32, i32) {
    %c0_i32 = arith.constant 0 : i32
    %c0_i32_0 = arith.constant 0 : i32
    %c0_i32_1 = arith.constant 0 : i32
    return %c0_i32, %c0_i32_0 : i32, i32
  }
  func.func @transform_2(%arg0: i32) -> (i32, i32) {
    %c0_i32 = arith.constant 0 : i32
    %c0_i32_0 = arith.constant 0 : i32
    %c0_i32_1 = arith.constant 0 : i32
    return %c0_i32, %c0_i32_0 : i32, i32
  }
  func.func @transform_3(%arg0: i32) -> (i32, i32) {
    %c0_i32 = arith.constant 0 : i32
    %c0_i32_0 = arith.constant 0 : i32
    %c0_i32_1 = arith.constant 0 : i32
    return %c0_i32, %c0_i32_0 : i32, i32
  }
  func.func @transform_4(%arg0: i32) -> (i32, i32) {
    %c0_i32 = arith.constant 0 : i32
    %c0_i32_0 = arith.constant 0 : i32
    %c0_i32_1 = arith.constant 0 : i32
    return %c0_i32, %c0_i32_0 : i32, i32
  }
  func.func @transform_5(%arg0: i32) -> (i32, i32) {
    %c0_i32 = arith.constant 0 : i32
    %c0_i32_0 = arith.constant 0 : i32
    return %arg0, %c0_i32 : i32, i32
  }
}

</mosaic_0001>

<bundles_post_ra>
// kernel: tpu_custom_call.1
= control target key start
LH: loop header
LB: loop body
LE: loop exit
PB: predicated region body
PF: predicated region fallthrough
CT: control target
= control target key end

     0   :  { %10 = vsyncpa [#allocation3], 0  ;;  %s1099_s0 = inlined_call_operand.hbm [shape: f32[16,32], index: 0, kind: input, shape index: {}]   ;;  %s1100_s1 = inlined_call_operand.hbm [shape: f32[16,16], index: 1, kind: input, shape index: {}]   ;;  %s1101_s2 = inlined_call_operand.vmem [shape: f32[1,16], index: 2, kind: input, shape index: {}]   ;;  %s1102_s3 = inlined_call_operand.hbm [shape: f32[16,32], index: 3, kind: input, shape index: {}]   ;;  %s1103_s4 = inlined_call_operand.vmem [shape: f32[1,32], index: 4, kind: input, shape index: {}]   ;;  %s1104_s5 = inlined_call_operand.hbm [shape: f32[16,32], index: 5, kind: output, shape index: {}]  }
   0x1   :  { %12 = vsyncpa [#allocation3 + $0x1], 0 }
   0x2   :  { %13 = vsyncpa [#allocation6], 0 }
   0x3   :  { %14 = vsyncpa [#allocation4], 0 }
   0x4   :  { %16 = vsyncpa [#allocation4 + $0x1], 0  ;;  %s860_s18 = smov 0   ;;  %s862_s19 = smov 0  }
   0x5   :  { %s864_s20 = smov 0   ;;  %s866_s21 = smov 0  }
   0x6 LB: > { %s881_s22 = sadd.s32 4294967295, %s818_s21   ;;  %s543_s23 = sadd.s32 4294967294, %s818_s21   ;;  %s818_s21 = sphi %s866_s21, %s1124_s21   ;;  %s814_s20 = sphi %s864_s20, %s1123_s20   ;;  %s810_s19 = sphi %s862_s19, %s1122_s19   ;;  %s806_s18 = sphi %s860_s18, %s1121_s18  }
   0x7   : > { %p42_p0 = scmp.ne.s32.totalorder %s810_s19, %s806_s18  ;;  %p1105_p1 = scmp.eq.s32.totalorder %s881_s22, 0 }
   0x8   : > { %p156_p3 = scmp.eq.s32.totalorder %s543_s23, 1  ;;  %p544_p5 = scmp.ge.s32.totalorder %s818_s21, 1 }
   0x9   : > { %p890_p4 = por %p1105_p1, %p42_p0  ;;  %p163_p7 = scmp.lt.s32.totalorder %s818_s21, 3 }
   0xa   : > { %p895_p6 = por %p156_p3, %p42_p0  ;;  %s820_s27 = smov [#allocation5]  }
   0xb   : > { %s1108_s24 = scalar_select %p890_p4, 1, 0 }
   0xc   : > { %s1109_s25 = scalar_select %p895_p6, 1, 0 }
   0xd   : > { %p900_p8 = pnand %p544_p5, %p163_p7  ;;  %s175_s28 = sshll.u32 %s820_s27, 4  ;;  %s904_s28 = int_to_ptr.vmem [resolvable:$true] %s175_s28 }
   0xe   : > { %s821_s30 = smov [#allocation7]   ;;  %s662_s9 = scalar_lea.hbm %s1100_s1, 256 }
   0xf   : > { %p601_p9 = pneg %p900_p8  ;;  %s191_s6 = sshll.u32 %s821_s30, 4  ;;  %s915_s6 = int_to_ptr.vmem [resolvable:$true] %s191_s6 }
  0x10   : > { %p663_p12 = scmp.ne.s32.totalorder %s1100_s1, %s662_s9  ;;  %p669_p5 = scmp.lt.u32.totalorder %s662_s9, %s1100_s1 }
  0x11   : > { %p911_p11 = pnand %p601_p9, %p1105_p1 }
  0x13   : > { %p664_p13 = pneg %p911_p11 }
  0x15   : > { %p665_p0 = pnand %p664_p13, %p663_p12 }
  0x17   : > { %p666_p3 = pneg %p665_p0 }
  0x19   : > { %p671_p7 = pnand %p669_p5, %p666_p3 }
  0x1b   : > { %674 = shalt.err (!%p671_p7)
}
  0x1c   : > { %s675_s14 = scalar_lea.vmem %s904_s28, 256  ;;  %p683_p2 = scmp.lt.s32.totalorder %s904_s28, %s904_s28 }
  0x1d   : > { %p676_p9 = scmp.ne.s32.totalorder %s904_s28, %s675_s14  ;;  %p684_p12 = scmp.lt.s32.totalorder %s675_s14, %s675_s14 }
  0x1f   : > { %p678_p10 = pnand %p676_p9, %p664_p13  ;;  %p685_p0 = por %p684_p12, %p683_p2 }
  0x21   : > { %p679_p1 = pneg %p678_p10 }
  0x23   : > { %p686_p6 = pnand %p685_p0, %p679_p1 }
  0x25   : > { %689 = shalt.err (!%p686_p6)
}
  0x26   : > { %s822_s15 = smov 128   ;;  %s823_s16 = smov 8  }
  0x27   : > { %604 = dma.hbm_to_vmem [thread:$0]  (!%p911_p11), %s1100_s1, 256, %s904_s28, [#allocation6], %s822_s15, %s822_s15, %s823_s16  }
  0x28   : > { %s690_s7 = scalar_lea.hbm %s1102_s3, 256 }
  0x29   : > { %p691_p2 = scmp.ne.s32.totalorder %s1102_s3, %s690_s7  ;;  %p697_p10 = scmp.lt.u32.totalorder %s690_s7, %s1102_s3 }
  0x2b   : > { %p693_p1 = pnand %p691_p2, %p664_p13 }
  0x2d   : > { %p694_p6 = pneg %p693_p1 }
  0x2f   : > { %p699_p3 = pnand %p697_p10, %p694_p6 }
  0x31   : > { %702 = shalt.err (!%p699_p3)
}
  0x32   : > { %s703_s28 = scalar_lea.vmem %s915_s6, 256  ;;  %p711_p12 = scmp.lt.s32.totalorder %s915_s6, %s915_s6 }
  0x33   : > { %p704_p5 = scmp.ne.s32.totalorder %s915_s6, %s703_s28  ;;  %p712_p0 = scmp.lt.s32.totalorder %s703_s28, %s703_s28 }
  0x35   : > { %p706_p7 = pnand %p704_p5, %p664_p13  ;;  %p713_p2 = por %p712_p0, %p711_p12 }
  0x37   : > { %p707_p9 = pneg %p706_p7 }
  0x39   : > { %p714_p1 = pnand %p713_p2, %p707_p9 }
  0x3b   : > { %717 = shalt.err (!%p714_p1)
}
  0x3c   : > { %607 = dma.hbm_to_vmem [thread:$0]  (!%p911_p11), %s1102_s3, 256, %s915_s6, [#allocation6], %s822_s15, %s822_s15, %s823_s16  }
  0x3d   : > { %s970_s14 = sadd.s32 1, %s818_s21   ;;  %s29_s29 = sadd.s32 1, %s814_s20 }
  0x3e   : > { %s26_s17 = ssub.s32 %s818_s21, %s970_s14  ;;  %p36_p13 = scmp.ne.s32.totalorder %s814_s20, %s810_s19 }
  0x3f   : > { %p27_p6 = scmp.eq.s32.totalorder %s26_s17, 0  ;;  %p37_p10 = scmp.eq.s32.totalorder %s818_s21, 0 }
  0x40   : > { %p1112_p3 = scmp.eq.s32.totalorder %s881_s22, 1  ;;  %p618_p7 = scmp.lt.s32.totalorder %s818_s21, 2 }
  0x41   : > { %s986_s27 = scalar_select %p27_p6, %s814_s20, %s29_s29  }
  0x42   : > { %p980_p5 = por %p1112_p3, %p36_p13  ;;  %p38_p9 = por %p37_p10, %p36_p13 }
  0x43   : > { %s208_s30 = sand.u32 1, %s814_s20   ;;  %s549_s6 = sshll.u32 %s818_s21, 7 }
  0x44   : > { %s1113_s23 = scalar_select %p980_p5, 1, 0 }
  0x45   : > { %s548_s7 = sshll.u32 %s208_s30, 3  ;;  %s993_s8 = scalar_lea.hbm %s1099_s0, %s549_s6 }
  0x46   : > { %s212_s9 = scalar_lea.vmem [#allocation2], %s548_s7  ;;  %p997_p11 = pnand %p618_p7, %p38_p9 }
  0x47   : > { %s219_s10 = sshll.u32 %s212_s9, 4  ;;  %s209_s28 = scalar_lea.sflag [#allocation3], %s208_s30  ;;  %s995_s10 = int_to_ptr.vmem [resolvable:$true] %s219_s10 }
  0x48   : > { %s718_s12 = scalar_lea.hbm %s993_s8, 128  ;;  %p720_p0 = pneg %p997_p11 }
  0x49   : > { %p719_p12 = scmp.ne.s32.totalorder %s993_s8, %s718_s12  ;;  %s723_s17 = scalar_lea.hbm %s1099_s0, 256 }
  0x4a   : > { %p724_p13 = scmp.lt.u32.totalorder %s993_s8, %s1099_s0  ;;  %p725_p6 = scmp.lt.u32.totalorder %s723_s17, %s718_s12 }
  0x4b   : > { %p721_p2 = pnand %p720_p0, %p719_p12  ;;  %p727_p3 = scmp.lt.u32.totalorder %s718_s12, %s993_s8 }
  0x4c   : > { %p726_p10 = por %p725_p6, %p724_p13 }
  0x4d   : > { %p722_p1 = pneg %p721_p2 }
  0x4e   : > { %p728_p7 = por %p727_p3, %p726_p10 }
  0x50   : > { %p729_p9 = pnand %p728_p7, %p722_p1 }
  0x52   : > { %732 = shalt.err (!%p729_p9)
}
  0x53   : > { %s733_s30 = scalar_lea.vmem %s995_s10, 128  ;;  %s824_s15 = smov [#allocation2]  }
  0x54   : > { %p734_p12 = scmp.ne.s32.totalorder %s995_s10, %s733_s30  ;;  %s738_s16 = sshll.u32 %s824_s15, 4  ;;  %s739_s16 = int_to_ptr.vmem [resolvable:$false] %s738_s16 }
  0x55   : > { %s740_s9 = scalar_lea.vmem %s739_s16, 256  ;;  %p741_p4 = scmp.lt.s32.totalorder %s995_s10, %s739_s16 }
  0x56   : > { %p736_p2 = pnand %p734_p12, %p720_p0  ;;  %p742_p13 = scmp.lt.s32.totalorder %s740_s9, %s733_s30 }
  0x58   : > { %p737_p5 = pneg %p736_p2  ;;  %p743_p6 = por %p742_p13, %p741_p4 }
  0x5a   : > { %p744_p10 = pnand %p743_p6, %p737_p5 }
  0x5c   : > { %747 = shalt.err (!%p744_p10)
}
  0x5d   : > { %611 = dma.hbm_to_vmem [thread:$0]  (!%p997_p11), %s993_s8, 128, %s995_s10, %s209_s28  }
  0x5e   : > { %228 = sbr.rel (%p900_p8) target bundleno = 667 (0x29b), region = 40  ;;  %s1029_s12 = sand.u32 (!%p900_p8), 1, %s810_s19  }
  0x5f   : > { %s551_s13 = sshll.u32 (!%p900_p8), %s1029_s12, 3  ;;  %s231_s29 = scalar_lea.sflag (!%p900_p8), [#allocation3], %s1029_s12 }
  0x60   : > { %s234_s17 = scalar_lea.vmem (!%p900_p8), [#allocation2], %s551_s13  ;;  %p1115_p4 = scmp.ne.s32.totalorder (!%p900_p8), %s1108_s24, 0 }
  0x65   : > { %793 = dma.done.wait (%p1115_p4), %s231_s29, 128  }
  0x66   : > { %795 = vsyncadd (%p1115_p4), %s231_s29, 4294967168  ;;  %p1116_p5 = scmp.eq.s32.totalorder %s881_s22, 0 }
  0x68   : > { %797 = dma.done.wait (%p1116_p5), [#allocation6], 512   ;;  %p1117_p8 = pmov %p1116_p5 }
  0x69   : > { %v825_v0 = vmov 0.0|0.0   ;;  %vm826_vm0 = vmmov 0   ;;  %v827_v1 = vmov 0.0   ;;  %v269_v2 = vld [vmem:[%s234_s17] sm:$0xff]  ;;  %v270_v3 = vld [vmem:[#allocation5] sm:$0xff]  ;;  %v271_v4 = vld [vmem:[#allocation5 + $0x8] sm:$0xff] }
  0x6a   : > { %799 = vsyncadd (%p1117_p8), [#allocation6], 4294966784  ;;  %583 = vmatprep.subr.bf16.mxu0 %v825_v0  ;;  %573 = vmatprep.mubr.msk.f32.mxu0 %vm826_vm0, %v827_v1  ;;  %s828_s26 = smov 112   ;;  %v584_v5 = vpack.c.bf16 %v271_v4, %v270_v3  ;;  %vm282_vm1 = vcmask 130048   ;;  %v356_v7 = vld [vmem:[#allocation7] sm:$0xff]  ;;  %v357_v8 = vld [vmem:[#allocation7 + $0x8] sm:$0xff] }
  0x6b   : > { %586 = vmatprep.subr.bf16.mxu1 %v825_v0  ;;  %580 = vmatprep.mubr.msk.f32.mxu1 %vm826_vm0, %v827_v1  ;;  %v587_v9 = vpack.c.bf16 %v357_v8, %v356_v7  ;;  %v555_v10 = vld [vmem:[%s1101_s2] ss:$0 sm:$0xff]  ;;  %s560_s28 = sshll.u32 %s881_s22, 7  ;;  %s268_s7 = scalar_lea.vmem [#allocation8], %s551_s13  ;;  %vm438_vm2 = vcmask 261120  }
  0x6c   : > { %280 = vrot.lane.b32.xlu0 %v269_v2, %s828_s26  ;;  %585 = vmatpush3.bf16.msra.mxu0 %v584_v5  ;;  %v557_v15 = vld [vmem:[%s1103_s4] ss:$0 sm:$0xff]  ;;  %s454_s6 = sshll.u32 %s268_s7, 4  ;;  %s1055_s16 = scalar_lea.hbm %s1104_s5, %s560_s28  ;;  %s1057_s6 = int_to_ptr.vmem [resolvable:$true] %s454_s6 }
  0x6d   : > { %588 = vmatpush3.bf16.msra.mxu1 %v587_v9  ;;  %s441_s9 = scalar_lea.sflag [#allocation4], %s1029_s12  ;;  %s748_s22 = scalar_lea.vmem %s1057_s6, 128 }
  0x6e   : > { %p749_p11 = scmp.ne.s32.totalorder %s1057_s6, %s748_s22  ;;  %p1118_p0 = scmp.ne.s32.totalorder %s1113_s23, 0 }
  0x6f   : > { %s829_s13 = smov [#allocation8]  }
  0x70   : > { %p750_p1 = pnand %p749_p11, %p1118_p0  ;;  %s752_s29 = sshll.u32 %s829_s13, 4  ;;  %s753_s29 = int_to_ptr.vmem [resolvable:$false] %s752_s29 }
  0x71   : > { %s754_s17 = scalar_lea.vmem %s753_s29, 256  ;;  %p755_p7 = scmp.lt.s32.totalorder %s1057_s6, %s753_s29 }
  0x72   : > { %p751_p3 = pneg %p750_p1  ;;  %p756_p9 = scmp.lt.s32.totalorder %s754_s17, %s748_s22 }
  0x74   : > { %p757_p12 = por %p756_p9, %p755_p7 }
  0x76   : > { %p758_p2 = pnand %p757_p12, %p751_p3 }
  0xde   : > { %v281_v6 = vpop.permute.xlu0 %280 }
  0xdf   : > { %574 = vmatmul.mubr.msk.f32.vlgmr.msra.gmra.mrb[0].mxu0 %vm282_vm1, %v281_v6 }
 0x1b2   : > { %v351_v11 = vpop.f32.mrb[0].mxu0 }
 0x1b3   : > { %v352_v12 = vadd.f32 %v555_v10, %v351_v11  ;;  %v575_v13 = vpop.f32.mrb[1].mxu0 }
 0x1b5   : > { %v355_v14 = vmul.f32 %v352_v12, %v269_v2 }
 0x1b7   : > { %581 = vmatmul.mubr.msk.f32.vlgmr.msra.gmra.mrb[0].mxu1 %vm282_vm1, %v355_v14 }
 0x28a   : > { %v434_v16 = vpop.f32.mrb[0].mxu1 }
 0x28b   : > { %v435_v17 = vadd.f32 %v557_v15, %v434_v16  ;;  %v582_v18 = vpop.f32.mrb[1].mxu1 }
 0x28d   : > { %439 = vst.msk [vmem:[%s268_s7] sm:$0xff] %vm438_vm2, %v435_v17 }
 0x28e   : > { %761 = shalt.err (!%p758_p2)
}
 0x28f   : > { %s762_s12 = scalar_lea.hbm %s1055_s16, 128  ;;  %s766_s8 = scalar_lea.hbm %s1104_s5, 256 }
 0x290   : > { %p763_p13 = scmp.ne.s32.totalorder %s1055_s16, %s762_s12  ;;  %p767_p4 = scmp.lt.u32.totalorder %s1055_s16, %s1104_s5 }
 0x291   : > { %p768_p5 = scmp.lt.u32.totalorder %s766_s8, %s762_s12  ;;  %p770_p11 = scmp.lt.u32.totalorder %s762_s12, %s1055_s16 }
 0x292   : > { %p764_p6 = pnand %p763_p13, %p1118_p0 }
 0x293   : > { %p769_p8 = por %p768_p5, %p767_p4 }
 0x294   : > { %p765_p10 = pneg %p764_p6 }
 0x295   : > { %p771_p1 = por %p770_p11, %p769_p8 }
 0x297   : > { %p772_p3 = pnand %p771_p1, %p765_p10 }
 0x299   : > { %775 = shalt.err (!%p772_p3)
}
 0x29a   : > { %599 = dma.vmem_to_hbm [thread:$0]  (%p1118_p0), %s1057_s6, 128, %s1055_s16, %s441_s9  }
 0x29b PF: > { %s466_s28 = sand.u32 1, %s806_s18   ;;  %p1119_p7 = scmp.ne.s32.totalorder %s1109_s25, 0 }
 0x29c   : > { %p1120_p9 = scmp.ge.s32.totalorder %s818_s21, 2  ;;  %s467_s7 = scalar_lea.sflag [#allocation4], %s466_s28 }
 0x29e   : > { %p613_p12 = pnand %p1120_p9, %p1119_p7 }
 0x2a0   : > { %801 = dma.done.wait (!%p613_p12), %s467_s7, 128  }
 0x2a1   : > { %803 = vsyncadd (!%p613_p12), %s467_s7, 4294967168  ;;  %p19_p2 = scmp.ge.s32.totalorder %s970_s14, 4   ;;  %s1121_s18 = smov %s810_s19 }
 0x2a2   : > { %s1122_s19 = smov %s814_s20  ;;  %s1123_s20 = smov %s986_s27 }
 0x2a3   : > { %s1124_s21 = smov %s970_s14  ;;  %21 = sbr.rel (!%p19_p2) target bundleno = 6 (0x6), region = 93 }
 0x2aa   :  { %472 = vsyncpa [#allocation3], 1 }
 0x2ab   :  { %474 = vsyncpa [#allocation3 + $0x1], 1 }
 0x2ac   :  { %475 = vsyncpa [#allocation6], 1 }
 0x2ad   :  { %476 = vsyncpa [#allocation4], 1 }
 0x2ae   :  { %478 = vsyncpa [#allocation4 + $0x1], 1 }

// kernel: tpu_custom_call.1
= control target key start
LH: loop header
LB: loop body
LE: loop exit
PB: predicated region body
PF: predicated region fallthrough
CT: control target
= control target key end

     0   :  { %10 = vsyncpa [#allocation3], 0  ;;  %s1099_s0 = inlined_call_operand.hbm [shape: f32[16,32], index: 0, kind: input, shape index: {}]   ;;  %s1100_s1 = inlined_call_operand.hbm [shape: f32[16,16], index: 1, kind: input, shape index: {}]   ;;  %s1101_s2 = inlined_call_operand.vmem [shape: f32[1,16], index: 2, kind: input, shape index: {}]   ;;  %s1102_s3 = inlined_call_operand.hbm [shape: f32[16,32], index: 3, kind: input, shape index: {}]   ;;  %s1103_s4 = inlined_call_operand.vmem [shape: f32[1,32], index: 4, kind: input, shape index: {}]   ;;  %s1104_s5 = inlined_call_operand.hbm [shape: f32[16,32], index: 5, kind: output, shape index: {}]  }
   0x1   :  { %12 = vsyncpa [#allocation3 + $0x1], 0 }
   0x2   :  { %13 = vsyncpa [#allocation6], 0 }
   0x3   :  { %14 = vsyncpa [#allocation4], 0 }
   0x4   :  { %16 = vsyncpa [#allocation4 + $0x1], 0  ;;  %s860_s18 = smov 0   ;;  %s862_s19 = smov 0  }
   0x5   :  { %s864_s20 = smov 0   ;;  %s866_s21 = smov 0  }
   0x6 LB: > { %s881_s22 = sadd.s32 4294967295, %s818_s21   ;;  %s543_s23 = sadd.s32 4294967294, %s818_s21   ;;  %s818_s21 = sphi %s866_s21, %s1124_s21   ;;  %s814_s20 = sphi %s864_s20, %s1123_s20   ;;  %s810_s19 = sphi %s862_s19, %s1122_s19   ;;  %s806_s18 = sphi %s860_s18, %s1121_s18  }
   0x7   : > { %p42_p0 = scmp.ne.s32.totalorder %s810_s19, %s806_s18  ;;  %p1105_p1 = scmp.eq.s32.totalorder %s881_s22, 0 }
   0x8   : > { %p156_p3 = scmp.eq.s32.totalorder %s543_s23, 1  ;;  %p544_p5 = scmp.ge.s32.totalorder %s818_s21, 1 }
   0x9   : > { %p890_p4 = por %p1105_p1, %p42_p0  ;;  %p163_p7 = scmp.lt.s32.totalorder %s818_s21, 3 }
   0xa   : > { %p895_p6 = por %p156_p3, %p42_p0  ;;  %s820_s27 = smov [#allocation5]  }
   0xb   : > { %s1108_s24 = scalar_select %p890_p4, 1, 0 }
   0xc   : > { %s1109_s25 = scalar_select %p895_p6, 1, 0 }
   0xd   : > { %p900_p8 = pnand %p544_p5, %p163_p7  ;;  %s175_s28 = sshll.u32 %s820_s27, 4  ;;  %s904_s28 = int_to_ptr.vmem [resolvable:$true] %s175_s28 }
   0xe   : > { %s821_s30 = smov [#allocation7]   ;;  %s662_s9 = scalar_lea.hbm %s1100_s1, 256 }
   0xf   : > { %p601_p9 = pneg %p900_p8  ;;  %s191_s6 = sshll.u32 %s821_s30, 4  ;;  %s915_s6 = int_to_ptr.vmem [resolvable:$true] %s191_s6 }
  0x10   : > { %p663_p12 = scmp.ne.s32.totalorder %s1100_s1, %s662_s9  ;;  %p669_p5 = scmp.lt.u32.totalorder %s662_s9, %s1100_s1 }
  0x11   : > { %p911_p11 = pnand %p601_p9, %p1105_p1 }
  0x13   : > { %p664_p13 = pneg %p911_p11 }
  0x15   : > { %p665_p0 = pnand %p664_p13, %p663_p12 }
  0x17   : > { %p666_p3 = pneg %p665_p0 }
  0x19   : > { %p671_p7 = pnand %p669_p5, %p666_p3 }
  0x1b   : > { %674 = shalt.err (!%p671_p7)
}
  0x1c   : > { %s675_s14 = scalar_lea.vmem %s904_s28, 256  ;;  %p683_p2 = scmp.lt.s32.totalorder %s904_s28, %s904_s28 }
  0x1d   : > { %p676_p9 = scmp.ne.s32.totalorder %s904_s28, %s675_s14  ;;  %p684_p12 = scmp.lt.s32.totalorder %s675_s14, %s675_s14 }
  0x1f   : > { %p678_p10 = pnand %p676_p9, %p664_p13  ;;  %p685_p0 = por %p684_p12, %p683_p2 }
  0x21   : > { %p679_p1 = pneg %p678_p10 }
  0x23   : > { %p686_p6 = pnand %p685_p0, %p679_p1 }
  0x25   : > { %689 = shalt.err (!%p686_p6)
}
  0x26   : > { %s822_s15 = smov 128   ;;  %s823_s16 = smov 8  }
  0x27   : > { %604 = dma.hbm_to_vmem [thread:$0]  (!%p911_p11), %s1100_s1, 256, %s904_s28, [#allocation6], %s822_s15, %s822_s15, %s823_s16  }
  0x28   : > { %s690_s7 = scalar_lea.hbm %s1102_s3, 256 }
  0x29   : > { %p691_p2 = scmp.ne.s32.totalorder %s1102_s3, %s690_s7  ;;  %p697_p10 = scmp.lt.u32.totalorder %s690_s7, %s1102_s3 }
  0x2b   : > { %p693_p1 = pnand %p691_p2, %p664_p13 }
  0x2d   : > { %p694_p6 = pneg %p693_p1 }
  0x2f   : > { %p699_p3 = pnand %p697_p10, %p694_p6 }
  0x31   : > { %702 = shalt.err (!%p699_p3)
}
  0x32   : > { %s703_s28 = scalar_lea.vmem %s915_s6, 256  ;;  %p711_p12 = scmp.lt.s32.totalorder %s915_s6, %s915_s6 }
  0x33   : > { %p704_p5 = scmp.ne.s32.totalorder %s915_s6, %s703_s28  ;;  %p712_p0 = scmp.lt.s32.totalorder %s703_s28, %s703_s28 }
  0x35   : > { %p706_p7 = pnand %p704_p5, %p664_p13  ;;  %p713_p2 = por %p712_p0, %p711_p12 }
  0x37   : > { %p707_p9 = pneg %p706_p7 }
  0x39   : > { %p714_p1 = pnand %p713_p2, %p707_p9 }
  0x3b   : > { %717 = shalt.err (!%p714_p1)
}
  0x3c   : > { %607 = dma.hbm_to_vmem [thread:$0]  (!%p911_p11), %s1102_s3, 256, %s915_s6, [#allocation6], %s822_s15, %s822_s15, %s823_s16  }
  0x3d   : > { %s970_s14 = sadd.s32 1, %s818_s21   ;;  %s29_s29 = sadd.s32 1, %s814_s20 }
  0x3e   : > { %s26_s17 = ssub.s32 %s818_s21, %s970_s14  ;;  %p36_p13 = scmp.ne.s32.totalorder %s814_s20, %s810_s19 }
  0x3f   : > { %p27_p6 = scmp.eq.s32.totalorder %s26_s17, 0  ;;  %p37_p10 = scmp.eq.s32.totalorder %s818_s21, 0 }
  0x40   : > { %p1112_p3 = scmp.eq.s32.totalorder %s881_s22, 1  ;;  %p618_p7 = scmp.lt.s32.totalorder %s818_s21, 2 }
  0x41   : > { %s986_s27 = scalar_select %p27_p6, %s814_s20, %s29_s29  }
  0x42   : > { %p980_p5 = por %p1112_p3, %p36_p13  ;;  %p38_p9 = por %p37_p10, %p36_p13 }
  0x43   : > { %s208_s30 = sand.u32 1, %s814_s20   ;;  %s549_s6 = sshll.u32 %s818_s21, 7 }
  0x44   : > { %s1113_s23 = scalar_select %p980_p5, 1, 0 }
  0x45   : > { %s548_s7 = sshll.u32 %s208_s30, 3  ;;  %s993_s8 = scalar_lea.hbm %s1099_s0, %s549_s6 }
  0x46   : > { %s212_s9 = scalar_lea.vmem [#allocation2], %s548_s7  ;;  %p997_p11 = pnand %p618_p7, %p38_p9 }
  0x47   : > { %s219_s10 = sshll.u32 %s212_s9, 4  ;;  %s209_s28 = scalar_lea.sflag [#allocation3], %s208_s30  ;;  %s995_s10 = int_to_ptr.vmem [resolvable:$true] %s219_s10 }
  0x48   : > { %s718_s12 = scalar_lea.hbm %s993_s8, 128  ;;  %p720_p0 = pneg %p997_p11 }
  0x49   : > { %p719_p12 = scmp.ne.s32.totalorder %s993_s8, %s718_s12  ;;  %s723_s17 = scalar_lea.hbm %s1099_s0, 256 }
  0x4a   : > { %p724_p13 = scmp.lt.u32.totalorder %s993_s8, %s1099_s0  ;;  %p725_p6 = scmp.lt.u32.totalorder %s723_s17, %s718_s12 }
  0x4b   : > { %p721_p2 = pnand %p720_p0, %p719_p12  ;;  %p727_p3 = scmp.lt.u32.totalorder %s718_s12, %s993_s8 }
  0x4c   : > { %p726_p10 = por %p725_p6, %p724_p13 }
  0x4d   : > { %p722_p1 = pneg %p721_p2 }
  0x4e   : > { %p728_p7 = por %p727_p3, %p726_p10 }
  0x50   : > { %p729_p9 = pnand %p728_p7, %p722_p1 }
  0x52   : > { %732 = shalt.err (!%p729_p9)
}
  0x53   : > { %s733_s30 = scalar_lea.vmem %s995_s10, 128  ;;  %s824_s15 = smov [#allocation2]  }
  0x54   : > { %p734_p12 = scmp.ne.s32.totalorder %s995_s10, %s733_s30  ;;  %s738_s16 = sshll.u32 %s824_s15, 4  ;;  %s739_s16 = int_to_ptr.vmem [resolvable:$false] %s738_s16 }
  0x55   : > { %s740_s9 = scalar_lea.vmem %s739_s16, 256  ;;  %p741_p4 = scmp.lt.s32.totalorder %s995_s10, %s739_s16 }
  0x56   : > { %p736_p2 = pnand %p734_p12, %p720_p0  ;;  %p742_p13 = scmp.lt.s32.totalorder %s740_s9, %s733_s30 }
  0x58   : > { %p737_p5 = pneg %p736_p2  ;;  %p743_p6 = por %p742_p13, %p741_p4 }
  0x5a   : > { %p744_p10 = pnand %p743_p6, %p737_p5 }
  0x5c   : > { %747 = shalt.err (!%p744_p10)
}
  0x5d   : > { %611 = dma.hbm_to_vmem [thread:$0]  (!%p997_p11), %s993_s8, 128, %s995_s10, %s209_s28  }
  0x5e   : > { %228 = sbr.rel (%p900_p8) target bundleno = 667 (0x29b), region = 40  ;;  %s1029_s12 = sand.u32 (!%p900_p8), 1, %s810_s19  }
  0x5f   : > { %s551_s13 = sshll.u32 (!%p900_p8), %s1029_s12, 3  ;;  %s231_s29 = scalar_lea.sflag (!%p900_p8), [#allocation3], %s1029_s12 }
  0x60   : > { %s234_s17 = scalar_lea.vmem (!%p900_p8), [#allocation2], %s551_s13  ;;  %p1115_p4 = scmp.ne.s32.totalorder (!%p900_p8), %s1108_s24, 0 }
  0x65   : > { %793 = dma.done.wait (%p1115_p4), %s231_s29, 128  }
  0x66   : > { %795 = vsyncadd (%p1115_p4), %s231_s29, 4294967168  ;;  %p1116_p5 = scmp.eq.s32.totalorder %s881_s22, 0 }
  0x68   : > { %797 = dma.done.wait (%p1116_p5), [#allocation6], 512   ;;  %p1117_p8 = pmov %p1116_p5 }
  0x69   : > { %v825_v0 = vmov 0.0|0.0   ;;  %vm826_vm0 = vmmov 0   ;;  %v827_v1 = vmov 0.0   ;;  %v269_v2 = vld [vmem:[%s234_s17] sm:$0xff]  ;;  %v270_v3 = vld [vmem:[#allocation5] sm:$0xff]  ;;  %v271_v4 = vld [vmem:[#allocation5 + $0x8] sm:$0xff] }
  0x6a   : > { %799 = vsyncadd (%p1117_p8), [#allocation6], 4294966784  ;;  %583 = vmatprep.subr.bf16.mxu0 %v825_v0  ;;  %573 = vmatprep.mubr.msk.f32.mxu0 %vm826_vm0, %v827_v1  ;;  %s828_s26 = smov 112   ;;  %v584_v5 = vpack.c.bf16 %v271_v4, %v270_v3  ;;  %vm282_vm1 = vcmask 130048   ;;  %v356_v7 = vld [vmem:[#allocation7] sm:$0xff]  ;;  %v357_v8 = vld [vmem:[#allocation7 + $0x8] sm:$0xff] }
  0x6b   : > { %586 = vmatprep.subr.bf16.mxu1 %v825_v0  ;;  %580 = vmatprep.mubr.msk.f32.mxu1 %vm826_vm0, %v827_v1  ;;  %v587_v9 = vpack.c.bf16 %v357_v8, %v356_v7  ;;  %v555_v10 = vld [vmem:[%s1101_s2] ss:$0 sm:$0xff]  ;;  %s560_s28 = sshll.u32 %s881_s22, 7  ;;  %s268_s7 = scalar_lea.vmem [#allocation8], %s551_s13  ;;  %vm438_vm2 = vcmask 261120  }
  0x6c   : > { %280 = vrot.lane.b32.xlu0 %v269_v2, %s828_s26  ;;  %585 = vmatpush3.bf16.msra.mxu0 %v584_v5  ;;  %v557_v15 = vld [vmem:[%s1103_s4] ss:$0 sm:$0xff]  ;;  %s454_s6 = sshll.u32 %s268_s7, 4  ;;  %s1055_s16 = scalar_lea.hbm %s1104_s5, %s560_s28  ;;  %s1057_s6 = int_to_ptr.vmem [resolvable:$true] %s454_s6 }
  0x6d   : > { %588 = vmatpush3.bf16.msra.mxu1 %v587_v9  ;;  %s441_s9 = scalar_lea.sflag [#allocation4], %s1029_s12  ;;  %s748_s22 = scalar_lea.vmem %s1057_s6, 128 }
  0x6e   : > { %p749_p11 = scmp.ne.s32.totalorder %s1057_s6, %s748_s22  ;;  %p1118_p0 = scmp.ne.s32.totalorder %s1113_s23, 0 }
  0x6f   : > { %s829_s13 = smov [#allocation8]  }
  0x70   : > { %p750_p1 = pnand %p749_p11, %p1118_p0  ;;  %s752_s29 = sshll.u32 %s829_s13, 4  ;;  %s753_s29 = int_to_ptr.vmem [resolvable:$false] %s752_s29 }
  0x71   : > { %s754_s17 = scalar_lea.vmem %s753_s29, 256  ;;  %p755_p7 = scmp.lt.s32.totalorder %s1057_s6, %s753_s29 }
  0x72   : > { %p751_p3 = pneg %p750_p1  ;;  %p756_p9 = scmp.lt.s32.totalorder %s754_s17, %s748_s22 }
  0x74   : > { %p757_p12 = por %p756_p9, %p755_p7 }
  0x76   : > { %p758_p2 = pnand %p757_p12, %p751_p3 }
  0xde   : > { %v281_v6 = vpop.permute.xlu0 %280 }
  0xdf   : > { %574 = vmatmul.mubr.msk.f32.vlgmr.msra.gmra.mrb[0].mxu0 %vm282_vm1, %v281_v6 }
 0x1b2   : > { %v351_v11 = vpop.f32.mrb[0].mxu0 }
 0x1b3   : > { %v352_v12 = vadd.f32 %v555_v10, %v351_v11  ;;  %v575_v13 = vpop.f32.mrb[1].mxu0 }
 0x1b5   : > { %v355_v14 = vmul.f32 %v352_v12, %v269_v2 }
 0x1b7   : > { %581 = vmatmul.mubr.msk.f32.vlgmr.msra.gmra.mrb[0].mxu1 %vm282_vm1, %v355_v14 }
 0x28a   : > { %v434_v16 = vpop.f32.mrb[0].mxu1 }
 0x28b   : > { %v435_v17 = vadd.f32 %v557_v15, %v434_v16  ;;  %v582_v18 = vpop.f32.mrb[1].mxu1 }
 0x28d   : > { %439 = vst.msk [vmem:[%s268_s7] sm:$0xff] %vm438_vm2, %v435_v17 }
 0x28e   : > { %761 = shalt.err (!%p758_p2)
}
 0x28f   : > { %s762_s12 = scalar_lea.hbm %s1055_s16, 128  ;;  %s766_s8 = scalar_lea.hbm %s1104_s5, 256 }
 0x290   : > { %p763_p13 = scmp.ne.s32.totalorder %s1055_s16, %s762_s12  ;;  %p767_p4 = scmp.lt.u32.totalorder %s1055_s16, %s1104_s5 }
 0x291   : > { %p768_p5 = scmp.lt.u32.totalorder %s766_s8, %s762_s12  ;;  %p770_p11 = scmp.lt.u32.totalorder %s762_s12, %s1055_s16 }
 0x292   : > { %p764_p6 = pnand %p763_p13, %p1118_p0 }
 0x293   : > { %p769_p8 = por %p768_p5, %p767_p4 }
 0x294   : > { %p765_p10 = pneg %p764_p6 }
 0x295   : > { %p771_p1 = por %p770_p11, %p769_p8 }
 0x297   : > { %p772_p3 = pnand %p771_p1, %p765_p10 }
 0x299   : > { %775 = shalt.err (!%p772_p3)
}
 0x29a   : > { %599 = dma.vmem_to_hbm [thread:$0]  (%p1118_p0), %s1057_s6, 128, %s1055_s16, %s441_s9  }
 0x29b PF: > { %s466_s28 = sand.u32 1, %s806_s18   ;;  %p1119_p7 = scmp.ne.s32.totalorder %s1109_s25, 0 }
 0x29c   : > { %p1120_p9 = scmp.ge.s32.totalorder %s818_s21, 2  ;;  %s467_s7 = scalar_lea.sflag [#allocation4], %s466_s28 }
 0x29e   : > { %p613_p12 = pnand %p1120_p9, %p1119_p7 }
 0x2a0   : > { %801 = dma.done.wait (!%p613_p12), %s467_s7, 128  }
 0x2a1   : > { %803 = vsyncadd (!%p613_p12), %s467_s7, 4294967168  ;;  %p19_p2 = scmp.ge.s32.totalorder %s970_s14, 4   ;;  %s1121_s18 = smov %s810_s19 }
 0x2a2   : > { %s1122_s19 = smov %s814_s20  ;;  %s1123_s20 = smov %s986_s27 }
 0x2a3   : > { %s1124_s21 = smov %s970_s14  ;;  %21 = sbr.rel (!%p19_p2) target bundleno = 6 (0x6), region = 93 }
 0x2aa   :  { %472 = vsyncpa [#allocation3], 1 }
 0x2ab   :  { %474 = vsyncpa [#allocation3 + $0x1], 1 }
 0x2ac   :  { %475 = vsyncpa [#allocation6], 1 }
 0x2ad   :  { %476 = vsyncpa [#allocation4], 1 }
 0x2ae   :  { %478 = vsyncpa [#allocation4 + $0x1], 1 }

</bundles_post_ra>
